<compile_context>
chip_gen: v6e
topology: v6e:2x2x1
jax: 0.10.0
libtpu: 0.0.40
codegen_flags: <defaults>
</compile_context>

<pallas_src>
import jax
import jax.numpy as jnp
import numpy as np
from jax.experimental import pallas as pl
from jax.experimental.pallas import tpu as pltpu


def _eca_kernel(x_ref, band_ref, o_ref):
    """One image per grid step.

    x_ref:    (C, H*W)  image, spatial axis on lanes
    band_ref: (C, C)    banded conv matrix (shared across the grid)
    o_ref:    (C, H*W)  rescaled output
    """
    x = x_ref[...]                                            # (C, HW) f32
    # Global average pool over the spatial (lane) axis.
    pooled = jnp.mean(x, axis=-1, keepdims=True)              # (C, 1)
    # k-tap channel conv folded into one banded matmul (zero padding baked in).
    logits = jnp.dot(band_ref[...], pooled,
                     preferred_element_type=jnp.float32)      # (C, 1)
    scale = 1.0 / (1.0 + jnp.exp(-logits))                    # sigmoid, (C, 1)
    # Channel-wise rescale: per-channel scalar broadcast along lanes.
    o_ref[...] = x * scale


def eca_forward(x_nchw, conv_w, *, k_size=3):
    """ECA forward.  x_nchw: (N, C, H, W) float; conv_w: k_size weights."""
    N, C, H, W = x_nchw.shape
    HW = H * W
    pad = (k_size - 1) // 2

    # NCHW -> (N, C, H*W): free reshape, H*W lands on the 128-lane axis.
    x3 = x_nchw.reshape(N, C, HW).astype(jnp.float32)

    # Banded (C, C) matrix equivalent of Conv1d(1, 1, k, padding=pad, bias=False)
    # (cross-correlation, zero padded):  band[i, j] = w[j - i + pad]  if valid.
    w = conv_w.reshape(-1).astype(jnp.float32)
    assert w.shape[0] == k_size
    idx = jnp.arange(C)
    d = idx[None, :] - idx[:, None] + pad                     # (C, C) tap index
    band = jnp.where((d >= 0) & (d < k_size),
                     w[jnp.clip(d, 0, k_size - 1)],
                     0.0).astype(jnp.float32)

    out3 = pl.pallas_call(
        _eca_kernel,
        out_shape=jax.ShapeDtypeStruct((N, C, HW), jnp.float32),
        grid=(N,),
        in_specs=[
            # One full image per grid step; batch dim squeezed away.
            pl.BlockSpec((None, C, HW), lambda n: (n, 0, 0)),
            # Same block index every step -> DMA'd once, stays resident.
            pl.BlockSpec((C, C), lambda n: (0, 0)),
        ],
        out_specs=pl.BlockSpec((None, C, HW), lambda n: (n, 0, 0)),
        compiler_params=pltpu.CompilerParams(
            dimension_semantics=("parallel",),
            # Per-image f32 block is C*H*W*4 bytes, double-buffered in + out.
            # 48 MiB lifts the v5e/v6e scoped defaults while staying under
            # v7x's 64 MiB physical VMEM.
            vmem_limit_bytes=48 * 1024 * 1024,
        ),
    )(x3, band)

    return out3.reshape(N, C, H, W)


def eca_reference(x_nchw, conv_w, *, k_size=3):
    """Pure-JAX reference of the PyTorch eca_layer forward."""
    N, C, H, W = x_nchw.shape
    pad = (k_size - 1) // 2
    w = conv_w.reshape(-1).astype(jnp.float32)
    xf = x_nchw.astype(jnp.float32)
    pooled = jnp.mean(xf, axis=(2, 3))                        # (N, C)
    p = jnp.pad(pooled, ((0, 0), (pad, pad)))                 # (N, C + 2*pad)
    y = sum(w[j] * p[:, j:j + C] for j in range(k_size))      # (N, C)
    s = jax.nn.sigmoid(y)
    return xf * s[:, :, None, None]


if __name__ == "__main__":
    N, C, H, W = 2, 16, 16, 16
    k_size = 3

    key = jax.random.PRNGKey(0)
    kx, kw = jax.random.split(key)
    x = jax.random.normal(kx, (N, C, H, W), dtype=jnp.float32)
    # Conv1d(1, 1, k_size, bias=False) weight (PyTorch shape (1, 1, k) -> (k,)).
    conv_w = (0.5 * jax.random.normal(kw, (k_size,))).astype(jnp.float32)

    out = jax.block_until_ready(eca_forward(x, conv_w, k_size=k_size))
    ref = jax.block_until_ready(eca_reference(x, conv_w, k_size=k_size))

    assert out.shape == x.shape and out.dtype == jnp.float32
    np.testing.assert_allclose(np.asarray(out), np.asarray(ref),
                               atol=1e-3, rtol=1e-3)
    print("KERNEL_OK")
</pallas_src>

<mosaic_0001>
module attributes {stable_mosaic.version = 11 : i64} {
  func.func @_eca_kernel(%arg0: i32, %arg1: memref<1x16x256xf32, #tpu.memory_space<vmem>>, %arg2: memref<16x16xf32, #tpu.memory_space<vmem>>, %arg3: memref<1x16x256xf32, #tpu.memory_space<vmem>>) attributes {dimension_semantics = [#tpu.dimension_semantics<parallel>], iteration_bounds = array<i64: 2>, scalar_prefetch = 0 : i64, scratch_operands = 0 : i64, tpu.core_type = #tpu.core_type<tc>, window_params = [{transform_indices = @transform_0, window_bounds = array<i64: 1, 16, 256>}, {pipeline_mode = #tpu.pipeline_mode<synchronous>, transform_indices = @transform_1, window_bounds = array<i64: 16, 16>}, {transform_indices = @transform_2, window_bounds = array<i64: 1, 16, 256>}]} {
    %c0 = arith.constant 0 : index
    %c0_0 = arith.constant 0 : index
    %c0_1 = arith.constant 0 : index
    %0 = vector.load %arg1[%c0, %c0_0, %c0_1] : memref<1x16x256xf32, #tpu.memory_space<vmem>>, vector<1x16x256xf32>
    %1 = vector.shape_cast %0 : vector<1x16x256xf32> to vector<16x256xf32>
    %cst = arith.constant dense<0.000000e+00> : vector<16xf32>
    %2 = vector.multi_reduction <add>, %1, %cst [1] : vector<16x256xf32> to vector<16xf32>
    %3 = vector.shape_cast %2 : vector<16xf32> to vector<16x1xf32>
    %cst_2 = arith.constant 2.560000e+02 : f32
    %4 = vector.broadcast %cst_2 : f32 to vector<16x1xf32>
    %5 = arith.divf %3, %4 : vector<16x1xf32>
    %c0_3 = arith.constant 0 : index
    %c0_4 = arith.constant 0 : index
    %6 = vector.load %arg2[%c0_3, %c0_4] : memref<16x16xf32, #tpu.memory_space<vmem>>, vector<16x16xf32>
    %cst_5 = arith.constant dense<0.000000e+00> : vector<16x1xf32>
    %7 = tpu.matmul %6, %5, %cst_5 {dimension_numbers = #tpu.dot_dimension_numbers<[1], [0], [0], [1], [0, 0, 1, 1], [], []>} : vector<16x16xf32>, vector<16x1xf32>, vector<16x1xf32> -> vector<16x1xf32>
    %cst_6 = arith.constant 0.000000e+00 : f32
    %8 = vector.broadcast %cst_6 : f32 to vector<16x1xf32>
    %9 = arith.subf %8, %7 : vector<16x1xf32>
    %10 = math.exp %9 : vector<16x1xf32>
    %cst_7 = arith.constant 1.000000e+00 : f32
    %11 = vector.broadcast %cst_7 : f32 to vector<16x1xf32>
    %12 = arith.addf %11, %10 : vector<16x1xf32>
    %cst_8 = arith.constant 1.000000e+00 : f32
    %13 = vector.broadcast %cst_8 : f32 to vector<16x1xf32>
    %14 = arith.divf %13, %12 : vector<16x1xf32>
    %15 = vector.broadcast %14 : vector<16x1xf32> to vector<16x256xf32>
    %16 = arith.mulf %1, %15 : vector<16x256xf32>
    %c0_9 = arith.constant 0 : index
    %c0_10 = arith.constant 0 : index
    %c0_11 = arith.constant 0 : index
    %17 = vector.load %arg3[%c0_9, %c0_10, %c0_11] : memref<1x16x256xf32, #tpu.memory_space<vmem>>, vector<1x16x256xf32>
    %18 = vector.shape_cast %17 : vector<1x16x256xf32> to vector<16x256xf32>
    %19 = vector.shape_cast %16 : vector<16x256xf32> to vector<1x16x256xf32>
    tpu.vector_store %arg3[%c0_9, %c0_10, %c0_11], %19 {strides = array<i32>} : memref<1x16x256xf32, #tpu.memory_space<vmem>>, vector<1x16x256xf32>,
    return
  }
  func.func @transform_0(%arg0: i32) -> (i32, i32, i32) {
    %c0_i32 = arith.constant 0 : i32
    %c0_i32_0 = arith.constant 0 : i32
    %c0_i32_1 = arith.constant 0 : i32
    return %arg0, %c0_i32, %c0_i32_0 : i32, i32, i32
  }
  func.func @transform_1(%arg0: i32) -> (i32, i32) {
    %c0_i32 = arith.constant 0 : i32
    %c0_i32_0 = arith.constant 0 : i32
    %c0_i32_1 = arith.constant 0 : i32
    return %c0_i32, %c0_i32_0 : i32, i32
  }
  func.func @transform_2(%arg0: i32) -> (i32, i32, i32) {
    %c0_i32 = arith.constant 0 : i32
    %c0_i32_0 = arith.constant 0 : i32
    %c0_i32_1 = arith.constant 0 : i32
    return %arg0, %c0_i32, %c0_i32_0 : i32, i32, i32
  }
}

</mosaic_0001>

<bundles_post_ra>
// kernel: tpu_custom_call.1
= control target key start
LH: loop header
LB: loop body
LE: loop exit
PB: predicated region body
PF: predicated region fallthrough
CT: control target
= control target key end

     0   :  { %7 = vsyncpa [#allocation3], 0  ;;  %s836_s0 = inlined_call_operand.hbm [shape: f32[2,16,256], index: 0, kind: input, shape index: {}]   ;;  %s837_s1 = inlined_call_operand.hbm [shape: f32[16,16], index: 1, kind: input, shape index: {}]   ;;  %s838_s2 = inlined_call_operand.hbm [shape: f32[2,16,256], index: 2, kind: output, shape index: {}]  }
   0x1   :  { %9 = vsyncpa [#allocation3 + $0x1], 0 }
   0x2   :  { %10 = vsyncpa [#allocation6], 0 }
   0x3   :  { %11 = vsyncpa [#allocation4], 0 }
   0x4   :  { %13 = vsyncpa [#allocation4 + $0x1], 0  ;;  %s655_s9 = smov 0   ;;  %s657_s10 = smov 0  }
   0x5   :  { %s659_s11 = smov 0   ;;  %s661_s12 = smov 0  }
   0x6 LB: > { %s676_s13 = sadd.s32 4294967295, %s628_s12   ;;  %s401_s14 = sadd.s32 4294967294, %s628_s12   ;;  %s628_s12 = sphi %s661_s12, %s860_s12   ;;  %s624_s11 = sphi %s659_s11, %s859_s11   ;;  %s620_s10 = sphi %s657_s10, %s858_s10   ;;  %s616_s9 = sphi %s655_s9, %s857_s9  }
   0x7   : > { %p39_p0 = scmp.ne.s32.totalorder %s620_s10, %s616_s9  ;;  %p839_p1 = scmp.eq.s32.totalorder %s676_s13, 0 }
   0x8   : > { %p90_p3 = scmp.eq.s32.totalorder %s401_s14, 1  ;;  %p402_p5 = scmp.ge.s32.totalorder %s628_s12, 1 }
   0x9   : > { %p685_p4 = por %p839_p1, %p39_p0  ;;  %p97_p7 = scmp.lt.s32.totalorder %s628_s12, 3 }
   0xa   : > { %p690_p6 = por %p90_p3, %p39_p0  ;;  %s630_s18 = smov [#allocation5]  }
   0xb   : > { %s843_s15 = scalar_select %p685_p4, 1, 0 }
   0xc   : > { %s844_s16 = scalar_select %p690_p6, 1, 0 }
   0xd   : > { %p695_p8 = pnand %p402_p5, %p97_p7  ;;  %s109_s19 = sshll.u32 %s630_s18, 4  ;;  %s110_s19 = int_to_ptr.vmem [resolvable:$true] %s109_s19 }
   0xe   : > { %s709_s21 = sadd.s32 1, %s628_s12   ;;  %s26_s22 = sadd.s32 1, %s624_s11 }
   0xf   : > { %s845_s17 = scalar_select %p695_p8, 1, 0 }
  0x10   : > { %p440_p9 = pneg %p695_p8  ;;  %s23_s23 = ssub.s32 %s628_s12, %s709_s21 }
  0x11   : > { %s517_s24 = scalar_lea.vmem %s110_s19, 256  ;;  %p525_p5 = scmp.lt.s32.totalorder %s110_s19, %s110_s19 }
  0x12   : > { %p704_p11 = pnand %p440_p9, %p839_p1  ;;  %p518_p13 = scmp.ne.s32.totalorder %s110_s19, %s517_s24 }
  0x13   : > { %p526_p7 = scmp.lt.s32.totalorder %s517_s24, %s517_s24 }
  0x14   : > { %p508_p12 = pneg %p704_p11 }
  0x15   : > { %p527_p10 = por %p526_p7, %p525_p5 }
  0x16   : > { %p520_p0 = pnand %p518_p13, %p508_p12 }
  0x18   : > { %p521_p3 = pneg %p520_p0 }
  0x1a   : > { %p528_p2 = pnand %p527_p10, %p521_p3 }
  0x1c   : > { %531 = shalt.err (!%p528_p2)
}
  0x1d   : > { %s631_s25 = smov 128   ;;  %s632_s26 = smov 8  }
  0x1e   : > { %443 = dma.hbm_to_vmem [thread:$0]  (!%p704_p11), %s837_s1, 256, %s110_s19, [#allocation6], %s631_s25, %s631_s25, %s632_s26  }
  0x1f   : > { %p24_p9 = scmp.eq.s32.totalorder %s23_s23, 0  ;;  %p33_p12 = scmp.ne.s32.totalorder %s624_s11, %s620_s10 }
  0x20   : > { %p34_p10 = scmp.eq.s32.totalorder %s628_s12, 0  ;;  %p453_p2 = scmp.lt.s32.totalorder %s628_s12, 2 }
  0x21   : > { %s726_s29 = scalar_select %p24_p9, %s624_s11, %s26_s22  }
  0x22   : > { %p35_p13 = por %p34_p10, %p33_p12  ;;  %p847_p0 = scmp.eq.s32.totalorder %s676_s13, 1 }
  0x23   : > { %s123_s3 = sand.u32 1, %s624_s11   ;;  %s419_s4 = sshll.u32 %s628_s12, 9 }
  0x24   : > { %p730_p3 = por %p847_p0, %p33_p12  ;;  %s405_s5 = sshll.u32 %s123_s3, 5 }
  0x25   : > { %s739_s8 = scalar_lea.hbm %s836_s0, %s419_s4  ;;  %s127_s14 = scalar_lea.vmem [#allocation2], %s405_s5 }
  0x26   : > { %s848_s30 = scalar_select %p730_p3, 1, 0 }
  0x27   : > { %s134_s18 = sshll.u32 %s127_s14, 4  ;;  %p741_p11 = pnand %p453_p2, %p35_p13  ;;  %s745_s18 = int_to_ptr.vmem [resolvable:$true] %s134_s18 }
  0x28   : > { %s747_s20 = scalar_lea.sflag [#allocation3], %s123_s3  ;;  %s532_s22 = scalar_lea.hbm %s739_s8, 512 }
  0x29   : > { %p533_p5 = scmp.ne.s32.totalorder %s739_s8, %s532_s22  ;;  %p534_p7 = pneg %p741_p11 }
  0x2a   : > { %s537_s25 = scalar_lea.hbm %s836_s0, 1024  ;;  %p538_p10 = scmp.lt.s32.totalorder %s739_s8, %s836_s0 }
  0x2b   : > { %p535_p9 = pnand %p534_p7, %p533_p5  ;;  %p539_p2 = scmp.lt.s32.totalorder %s537_s25, %s532_s22 }
  0x2d   : > { %p536_p12 = pneg %p535_p9  ;;  %p540_p13 = por %p539_p2, %p538_p10 }
  0x2f   : > { %p541_p0 = pnand %p540_p13, %p536_p12 }
  0x31   : > { %544 = shalt.err (!%p541_p0)
}
  0x32   : > { %s545_s28 = scalar_lea.vmem %s745_s18, 512  ;;  %s633_s3 = smov [#allocation2]  }
  0x33   : > { %p546_p1 = scmp.ne.s32.totalorder %s745_s18, %s545_s28  ;;  %s550_s4 = sshll.u32 %s633_s3, 4  ;;  %s551_s4 = int_to_ptr.vmem [resolvable:$false] %s550_s4 }
  0x34   : > { %s552_s5 = scalar_lea.vmem %s551_s4, 1024  ;;  %p553_p9 = scmp.lt.s32.totalorder %s745_s18, %s551_s4 }
  0x35   : > { %p548_p6 = pnand %p546_p1, %p534_p7  ;;  %p554_p3 = scmp.lt.s32.totalorder %s552_s5, %s545_s28 }
  0x37   : > { %p549_p5 = pneg %p548_p6  ;;  %p555_p4 = por %p554_p3, %p553_p9 }
  0x39   : > { %p556_p8 = pnand %p555_p4, %p549_p5 }
  0x3b   : > { %559 = shalt.err (!%p556_p8)
}
  0x3c   : > { %s634_s6 = smov 256   ;;  %s635_s7 = smov 16  }
  0x3d   : > { %447 = dma.hbm_to_vmem [thread:$0]  (!%p741_p11), %s739_s8, 512, %s745_s18, %s747_s20, %s634_s6, %s634_s6, %s635_s7  }
  0x3e   : > { %p850_p1 = scmp.ne.s32.totalorder %s845_s17, 0 }
  0x3f   : > { %s771_s14 = sand.u32 (!%p850_p1), 1, %s620_s10   ;;  %p851_p4 = scmp.ne.s32.totalorder (!%p850_p1), %s843_s15, 0 }
  0x40   : > { %146 = sbr.rel (%p850_p1) target bundleno = 595 (0x253), region = 28  ;;  %s409_s22 = sshll.u32 (!%p850_p1), %s771_s14, 5 }
  0x41   : > { %s149_s23 = scalar_lea.sflag (!%p850_p1), [#allocation3], %s771_s14  ;;  %s152_s24 = scalar_lea.vmem (!%p850_p1), [#allocation2], %s409_s22 }
  0x45   : > { %603 = dma.done.wait (%p851_p4), %s149_s23, 512  }
  0x46   : > { %605 = vsyncadd (%p851_p4), %s149_s23, 4294966784  ;;  %p852_p6 = scmp.eq.s32.totalorder %s676_s13, 0 }
  0x48   : > { %607 = dma.done.wait (%p852_p6), [#allocation6], 256   ;;  %p853_p8 = pmov %p852_p6 }
  0x49   : > { %v179_v0 = vld [vmem:[%s152_s24 + $0x10] sm:$0xff]  ;;  %v180_v1 = vld [vmem:[%s152_s24 + $0x18] sm:$0xff]  ;;  %v177_v2 = vld [vmem:[%s152_s24] sm:$0xff]  ;;  %vm192_vm0 = vcmask 130048   ;;  %v636_v12 = vmov 0   ;;  %s176_s15 = scalar_lea.vmem [#allocation7], %s409_s22 }
  0x4a   : > { %609 = vsyncadd (%p853_p8), [#allocation6], 4294967040  ;;  %v184_v3 = vadd.f32 %v180_v1, %v179_v0  ;;  %v178_v4 = vld [vmem:[%s152_s24 + $0x8] sm:$0xff]  ;;  %v190_v6 = vld [vmem:[#allocation5] sm:$0xff]  ;;  %496 = vset.pattern.permute.xlu1 %v636_v12  ;;  %497 = vset.pattern.permute.xlu0 %v636_v12  ;;  %s318_s17 = sshll.u32 %s176_s15, 4  ;;  %s420_s8 = sshll.u32 %s676_s13, 9  ;;  %s788_s17 = int_to_ptr.vmem [resolvable:$true] %s318_s17 }
  0x4b   : > { %v181_v5 = vadd.f32 %v178_v4, %v177_v2  ;;  %429 = vmatprep.mubr.msk.f32.mxu0 %vm192_vm0, %v190_v6  ;;  %v191_v11 = vld [vmem:[#allocation5 + $0x8] sm:$0xff]  ;;  %s793_s20 = scalar_lea.hbm %s838_s2, %s420_s8  ;;  %s305_s25 = scalar_lea.sflag [#allocation4], %s771_s14 }
  0x4c   : > { %185 = vadd.xlane.f32.xlu0 %v184_v3  ;;  %s560_s26 = scalar_lea.vmem %s788_s17, 512  ;;  %p854_p11 = scmp.ne.s32.totalorder %s848_s30, 0 }
  0x4d   : > { %p561_p3 = scmp.ne.s32.totalorder %s788_s17, %s560_s26  ;;  %s637_s13 = smov [#allocation7]  }
  0x4e   : > { %s564_s27 = sshll.u32 %s637_s13, 4  ;;  %s565_s27 = int_to_ptr.vmem [resolvable:$false] %s564_s27 }
  0x4f   : > { %p562_p7 = pnand %p561_p3, %p854_p11  ;;  %s566_s28 = scalar_lea.vmem %s565_s27, 1024 }
  0x50   : > { %182 = vadd.xlane.f32.xlu0 %v181_v5  ;;  %p567_p10 = scmp.lt.s32.totalorder %s788_s17, %s565_s27  ;;  %p568_p2 = scmp.lt.s32.totalorder %s566_s28, %s560_s26 }
  0x51   : > { %p563_p12 = pneg %p562_p7 }
  0x52   : > { %p569_p13 = por %p568_p2, %p567_p10 }
  0x54   : > { %p570_p0 = pnand %p569_p13, %p563_p12 }
  0xd5   : > { %v186_v7 = vpop.xlane.xlu0 %185 }
  0xd6   : > { %v189_v8 = vmul.f32 0.00390625, %v186_v7 }
  0xd8   : > { %425 = vmatprep.subr.mxu0 %v189_v8 }
  0xd9   : > { %426 = vmatpush3.msra.mxu0 %v189_v8  ;;  %v183_v9 = vpop.xlane.xlu0 %182 }
  0xda   : > { %v188_v10 = vmul.f32 0.00390625, %v183_v9 }
  0xdc   : > { %427 = vmatprep.subr.mxu0 %v188_v10 }
  0xdd   : > { %428 = vmatpush3.msra.mxu0 %v188_v10 }
  0xde   : > { %430 = vmatmul.mubr.msk.f32.vlgmr.msra.gmra.mxu0 %vm192_vm0, %v191_v11 }
 0x19e   : > { %v431_v13 = vpop.f32.mrf.mxu0 }
 0x19f   : > { %v275_v14 = vsub.f32 0.0, %v431_v13 }
 0x1a0   : > { %v265_v15 = vpop.f32.mrf.mxu0 }
 0x1a1   : > { %v278_v16 = vmul.f32 1.442695, %v275_v14  ;;  %v274_v17 = vsub.f32 0.0, %v265_v15 }
 0x1a3   : > { %v276_v18 = vmul.f32 1.442695, %v274_v17  ;;  %498 = vpow2.f32 %v278_v16 }
 0x1a5   : > { %500 = vpow2.f32 %v276_v18 }
 0x1b0   : > { %v499_v19 = vpop.eup %498 }
 0x1b1   : > { %v281_v22 = vadd.f32 1.0, %v499_v19 }
 0x1b2   : > { %v501_v20 = vpop.eup %500 }
 0x1b3   : > { %v280_v21 = vadd.f32 1.0, %v501_v20 }
 0x1b5   : > { %502 = vrcp.f32 %v280_v21 }
 0x1b6   : > { %504 = vrcp.f32 %v281_v22 }
 0x1c2   : > { %v503_v23 = vpop.eup %502 }
 0x1c3   : > { %288 = vperm.xlu1 %496, %v503_v23   ;;  %v505_v24 = vpop.eup %504 }
 0x1c7   : > { %293 = vperm.xlu1 %496, %v505_v24  }
 0x23e   : > { %v289_v25 = vpop.permute.xlu1 %288 }
 0x23f   : > { %v296_v26 = vmul.f32 %v289_v25, %v177_v2  ;;  %v297_v27 = vmul.f32 %v289_v25, %v178_v4 }
 0x241   : > { %300 = vst [vmem:[%s176_s15] sm:$0xff] %v296_v26  ;;  %301 = vst [vmem:[%s176_s15 + $0x8] sm:$0xff] %v297_v27 }
 0x242   : > { %v294_v28 = vpop.permute.xlu1 %293 }
 0x243   : > { %v298_v29 = vmul.f32 %v294_v28, %v179_v0  ;;  %v299_v30 = vmul.f32 %v294_v28, %v180_v1 }
 0x245   : > { %302 = vst [vmem:[%s176_s15 + $0x10] sm:$0xff] %v298_v29  ;;  %303 = vst [vmem:[%s176_s15 + $0x18] sm:$0xff] %v299_v30 }
 0x246   : > { %573 = shalt.err (!%p570_p0)
}
 0x247   : > { %s574_s3 = scalar_lea.hbm %s793_s20, 512  ;;  %s578_s6 = scalar_lea.hbm %s838_s2, 1024 }
 0x248   : > { %p575_p5 = scmp.ne.s32.totalorder %s793_s20, %s574_s3  ;;  %p579_p4 = scmp.lt.s32.totalorder %s793_s20, %s838_s2 }
 0x249   : > { %p580_p6 = scmp.lt.s32.totalorder %s578_s6, %s574_s3 }
 0x24a   : > { %p576_p9 = pnand %p575_p5, %p854_p11 }
 0x24b   : > { %p581_p8 = por %p580_p6, %p579_p4 }
 0x24c   : > { %p577_p1 = pneg %p576_p9 }
 0x24e   : > { %p582_p3 = pnand %p581_p8, %p577_p1 }
 0x250   : > { %585 = shalt.err (!%p582_p3)
}
 0x251   : > { %s638_s23 = smov 256   ;;  %s639_s24 = smov 16  }
 0x252   : > { %438 = dma.vmem_to_hbm [thread:$0]  (%p854_p11), %s788_s17, 512, %s793_s20, %s305_s25, %s638_s23, %s638_s23, %s639_s24  }
 0x253 PF: > { %s333_s15 = sand.u32 1, %s616_s9   ;;  %p855_p7 = scmp.ne.s32.totalorder %s844_s16, 0 }
 0x254   : > { %p856_p12 = scmp.ge.s32.totalorder %s628_s12, 2  ;;  %s334_s8 = scalar_lea.sflag [#allocation4], %s333_s15 }
 0x256   : > { %p449_p10 = pnand %p856_p12, %p855_p7 }
 0x258   : > { %p450_p2 = pneg %p449_p10 }
 0x25a   : > { %611 = dma.done.wait (%p450_p2), %s334_s8, 512  }
 0x25b   : > { %613 = vsyncadd (%p450_p2), %s334_s8, 4294966784  ;;  %p16_p13 = scmp.ge.s32.totalorder %s709_s21, 4   ;;  %s857_s9 = smov %s620_s10 }
 0x25c   : > { %s858_s10 = smov %s624_s11  ;;  %s859_s11 = smov %s726_s29 }
 0x25d   : > { %s860_s12 = smov %s709_s21  ;;  %18 = sbr.rel (!%p16_p13) target bundleno = 6 (0x6), region = 77 }
 0x262   :  { %339 = vsyncpa [#allocation3], 1 }
 0x263   :  { %341 = vsyncpa [#allocation3 + $0x1], 1 }
 0x264   :  { %342 = vsyncpa [#allocation6], 1 }
 0x265   :  { %343 = vsyncpa [#allocation4], 1 }
 0x266   :  { %345 = vsyncpa [#allocation4 + $0x1], 1 }

</bundles_post_ra>
